<compile_context>
chip_gen: v6e
topology: v6e:2x2x1
jax: 0.10.0
libtpu: 0.0.40
codegen_flags: <defaults>
</compile_context>

<pallas_src>
import jax
import jax.numpy as jnp
import numpy as np
from jax import lax
from jax.experimental import pallas as pl
from jax.experimental.pallas import tpu as pltpu

LANES = 128


def gru_kernel(x_ref, wih_ref, whh_ref, bih_ref, bhhn_ref, h0_ref, hout_ref):
    """Single-layer GRU over the whole (short) sequence; writes the final hidden.

    x_ref:    (S, I)    input sequence
    wih_ref:  (I, G)    input->hidden weights, gate-compact [r|z|n|pad] on lanes
    whh_ref:  (H, G)    hidden->hidden weights, same lane layout
    bih_ref:  (1, G)    b_ih with b_hr/b_hz pre-folded in (n-gate slot holds b_in only)
    bhhn_ref: (1, H)    b_hn (added inside the r*(...) term)
    h0_ref:   (1, H)    initial hidden
    hout_ref: (1, H)    final hidden (aliased to h0)
    """
    S = x_ref.shape[0]
    H = h0_ref.shape[1]

    # One MXU matmul for every timestep's input projection (+ folded biases);
    # kept as a value (a handful of vregs), no VMEM scratch round-trip.
    xw_all = (
        jnp.dot(x_ref[...], wih_ref[...], preferred_element_type=jnp.float32)
        + bih_ref[...]
    )  # (S, G)

    bhh_n = bhhn_ref[...]  # (1, H)
    h = h0_ref[...]        # (1, H)

    # Trace-time unrolled recurrence: S is small and static, so every slice
    # below is a static sublane/lane slice and the LLO scheduler sees the
    # whole serial dependency chain.
    for t in range(S):
        xw = xw_all[t:t + 1, :]                                             # (1, G)
        hw = jnp.dot(h, whh_ref[...], preferred_element_type=jnp.float32)   # (1, G)
        rz = jax.nn.sigmoid(xw[:, 0:2 * H] + hw[:, 0:2 * H])                # (1, 2H)
        r = rz[:, 0:H]
        z = rz[:, H:2 * H]
        n = jnp.tanh(xw[:, 2 * H:3 * H] + r * (hw[:, 2 * H:3 * H] + bhh_n))
        h = (1.0 - z) * n + z * h

    hout_ref[...] = h


def prepare_gru_params(raw):
    """One-time conversion from PyTorch nn.GRU layout to the kernel layout.

    raw: dict with weight_ih (3H, I), weight_hh (3H, H), bias_ih (3H,), bias_hh (3H,)
         in PyTorch gate order [r|z|n].
    Returns pre-padded / pre-folded arrays; call this ONCE, not per forward.
    """
    w_ih = jnp.asarray(raw["weight_ih"], jnp.float32)  # (3H, I)
    w_hh = jnp.asarray(raw["weight_hh"], jnp.float32)  # (3H, H)
    b_ih = jnp.asarray(raw["bias_ih"], jnp.float32)    # (3H,)
    b_hh = jnp.asarray(raw["bias_hh"], jnp.float32)    # (3H,)

    H = w_hh.shape[1]
    I = w_ih.shape[1]
    G = max(LANES, ((3 * H + LANES - 1) // LANES) * LANES)  # gate slab lane width

    # Compact gate layout on the lane axis: [r | z | n | zero-pad]  (width G).
    wih_c = jnp.pad(w_ih.T, ((0, 0), (0, G - 3 * H)))       # (I, G)
    whh_c = jnp.pad(w_hh.T, ((0, 0), (0, G - 3 * H)))       # (H, G)

    # Fold b_hr, b_hz into the input bias; keep b_hn separate (it must sit
    # inside the r * (...) term of the n gate).
    bih_full = b_ih.at[:2 * H].add(b_hh[:2 * H])            # (3H,)
    bih_c = jnp.pad(bih_full.reshape(1, 3 * H), ((0, 0), (0, G - 3 * H)))  # (1, G)
    bhh_n = b_hh[2 * H:3 * H].reshape(1, H)                  # (1, H)

    return {"wih_c": wih_c, "whh_c": whh_c, "bih_c": bih_c, "bhh_n": bhh_n,
            "H": int(H), "I": int(I), "G": int(G)}


def controller_latent_forward(x, prep, hidden=None, cell=None):
    """Mirrors ControllerLatent.forward for the (default) GRU case.

    x: (seq_len, input_dim) float32
    prep: output of prepare_gru_params (pre-laid-out weights)
    returns: (hidden, cell) with hidden (1, H) and cell = None
    """
    H = prep["H"]

    if hidden is None:
        hidden = jnp.zeros((1, H), dtype=jnp.float32)
    else:
        hidden = hidden.astype(jnp.float32)

    vmem = pl.BlockSpec(memory_space=pltpu.MemorySpace.VMEM)

    h_out = pl.pallas_call(
        gru_kernel,
        out_shape=jax.ShapeDtypeStruct((1, H), jnp.float32),
        in_specs=[vmem] * 6,
        out_specs=vmem,
        input_output_aliases={5: 0},  # h0 buffer updated in place -> final hidden
    )(x.astype(jnp.float32), prep["wih_c"], prep["whh_c"],
      prep["bih_c"], prep["bhh_n"], hidden)

    cell = None  # GRU path of the module always returns cell = None
    return h_out, cell


def init_gru_params(key, input_dim, hidden_dim):
    """Deterministic init matching nn.GRU's U(-1/sqrt(H), 1/sqrt(H)) scheme,
    returned in the native PyTorch layout (prepare_gru_params converts once)."""
    k = 1.0 / np.sqrt(hidden_dim)
    keys = jax.random.split(key, 4)
    return {
        "weight_ih": jax.random.uniform(keys[0], (3 * hidden_dim, input_dim),
                                        jnp.float32, -k, k),
        "weight_hh": jax.random.uniform(keys[1], (3 * hidden_dim, hidden_dim),
                                        jnp.float32, -k, k),
        "bias_ih": jax.random.uniform(keys[2], (3 * hidden_dim,), jnp.float32, -k, k),
        "bias_hh": jax.random.uniform(keys[3], (3 * hidden_dim,), jnp.float32, -k, k),
    }


def gru_reference(x, raw, hidden):
    """Pure-JAX reference of PyTorch's GRU recurrence (for correctness check)."""
    w_ih, w_hh = raw["weight_ih"], raw["weight_hh"]
    b_ih, b_hh = raw["bias_ih"], raw["bias_hh"]
    H = w_hh.shape[1]

    def step(h, xt):
        gi = xt @ w_ih.T + b_ih            # (3H,)
        gh = (h @ w_hh.T + b_hh)[0]        # (3H,)
        r = jax.nn.sigmoid(gi[0:H] + gh[0:H])
        z = jax.nn.sigmoid(gi[H:2 * H] + gh[H:2 * H])
        n = jnp.tanh(gi[2 * H:3 * H] + r * gh[2 * H:3 * H])
        h_new = (1.0 - z) * n + z * h[0]
        return h_new[None, :], None

    h_final, _ = lax.scan(step, hidden, x)
    return h_final


if __name__ == "__main__":
    seq_len, input_dim, hidden_dim = 8, 16, 32

    root = jax.random.PRNGKey(0)
    k_x, k_p = jax.random.split(root)
    x = jax.random.normal(k_x, (seq_len, input_dim), dtype=jnp.float32)
    raw_params = init_gru_params(k_p, input_dim, hidden_dim)

    # One-time parameter preparation (hoisted out of the forward pass).
    prep = prepare_gru_params(raw_params)

    hidden, cell = controller_latent_forward(x, prep, hidden=None)
    hidden = jax.block_until_ready(hidden)

    # sanity check against pure-JAX reference of the PyTorch recurrence
    h_ref = gru_reference(x, raw_params, jnp.zeros((1, hidden_dim), jnp.float32))
    np.testing.assert_allclose(np.asarray(hidden), np.asarray(h_ref),
                               rtol=1e-5, atol=1e-5)
    assert hidden.shape == (1, hidden_dim)
    assert cell is None

    print("KERNEL_OK")
</pallas_src>

<mosaic_0001>
module attributes {stable_mosaic.version = 11 : i64} {
  func.func @gru_kernel(%arg0: memref<8x16xf32, #tpu.memory_space<vmem>>, %arg1: memref<16x128xf32, #tpu.memory_space<vmem>>, %arg2: memref<32x128xf32, #tpu.memory_space<vmem>>, %arg3: memref<1x128xf32, #tpu.memory_space<vmem>>, %arg4: memref<1x32xf32, #tpu.memory_space<vmem>>, %arg5: memref<1x32xf32, #tpu.memory_space<vmem>>, %arg6: memref<1x32xf32, #tpu.memory_space<vmem>>) attributes {dimension_semantics = [], scalar_prefetch = 0 : i64, scratch_operands = 0 : i64, tpu.core_type = #tpu.core_type<tc>} {
    %c0 = arith.constant 0 : index
    %c0_0 = arith.constant 0 : index
    %0 = vector.load %arg0[%c0, %c0_0] : memref<8x16xf32, #tpu.memory_space<vmem>>, vector<8x16xf32>
    %c0_1 = arith.constant 0 : index
    %c0_2 = arith.constant 0 : index
    %1 = vector.load %arg1[%c0_1, %c0_2] : memref<16x128xf32, #tpu.memory_space<vmem>>, vector<16x128xf32>
    %cst = arith.constant dense<0.000000e+00> : vector<8x128xf32>
    %2 = tpu.matmul %0, %1, %cst {dimension_numbers = #tpu.dot_dimension_numbers<[1], [0], [0], [1], [0, 0, 1, 1], [], []>} : vector<8x16xf32>, vector<16x128xf32>, vector<8x128xf32> -> vector<8x128xf32>
    %c0_3 = arith.constant 0 : index
    %c0_4 = arith.constant 0 : index
    %3 = vector.load %arg3[%c0_3, %c0_4] : memref<1x128xf32, #tpu.memory_space<vmem>>, vector<1x128xf32>
    %4 = vector.broadcast %3 : vector<1x128xf32> to vector<8x128xf32>
    %5 = arith.addf %2, %4 : vector<8x128xf32>
    %c0_5 = arith.constant 0 : index
    %c0_6 = arith.constant 0 : index
    %6 = vector.load %arg4[%c0_5, %c0_6] : memref<1x32xf32, #tpu.memory_space<vmem>>, vector<1x32xf32>
    %c0_7 = arith.constant 0 : index
    %c0_8 = arith.constant 0 : index
    %7 = vector.load %arg5[%c0_7, %c0_8] : memref<1x32xf32, #tpu.memory_space<vmem>>, vector<1x32xf32>
    %8 = vector.extract_strided_slice %5 {offsets = [0, 0], sizes = [1, 128], strides = [1, 1]} : vector<8x128xf32> to vector<1x128xf32>
    %c0_9 = arith.constant 0 : index
    %c0_10 = arith.constant 0 : index
    %9 = vector.load %arg2[%c0_9, %c0_10] : memref<32x128xf32, #tpu.memory_space<vmem>>, vector<32x128xf32>
    %cst_11 = arith.constant dense<0.000000e+00> : vector<1x128xf32>
    %10 = tpu.matmul %7, %9, %cst_11 {dimension_numbers = #tpu.dot_dimension_numbers<[1], [0], [0], [1], [0, 0, 1, 1], [], []>} : vector<1x32xf32>, vector<32x128xf32>, vector<1x128xf32> -> vector<1x128xf32>
    %11 = vector.extract_strided_slice %8 {offsets = [0, 0], sizes = [1, 64], strides = [1, 1]} : vector<1x128xf32> to vector<1x64xf32>
    %12 = vector.extract_strided_slice %10 {offsets = [0, 0], sizes = [1, 64], strides = [1, 1]} : vector<1x128xf32> to vector<1x64xf32>
    %13 = arith.addf %11, %12 : vector<1x64xf32>
    %14 = arith.negf %13 : vector<1x64xf32>
    %15 = math.exp %14 : vector<1x64xf32>
    %cst_12 = arith.constant 1.000000e+00 : f32
    %16 = vector.broadcast %cst_12 : f32 to vector<1x64xf32>
    %17 = arith.addf %16, %15 : vector<1x64xf32>
    %18 = arith.divf %16, %17 : vector<1x64xf32>
    %19 = vector.extract_strided_slice %18 {offsets = [0, 0], sizes = [1, 32], strides = [1, 1]} : vector<1x64xf32> to vector<1x32xf32>
    %20 = vector.extract_strided_slice %18 {offsets = [0, 32], sizes = [1, 32], strides = [1, 1]} : vector<1x64xf32> to vector<1x32xf32>
    %21 = vector.extract_strided_slice %8 {offsets = [0, 64], sizes = [1, 32], strides = [1, 1]} : vector<1x128xf32> to vector<1x32xf32>
    %22 = vector.extract_strided_slice %10 {offsets = [0, 64], sizes = [1, 32], strides = [1, 1]} : vector<1x128xf32> to vector<1x32xf32>
    %23 = arith.addf %22, %6 : vector<1x32xf32>
    %24 = arith.mulf %19, %23 : vector<1x32xf32>
    %25 = arith.addf %21, %24 : vector<1x32xf32>
    %26 = math.tanh %25 : vector<1x32xf32>
    %cst_13 = arith.constant 1.000000e+00 : f32
    %27 = vector.broadcast %cst_13 : f32 to vector<1x32xf32>
    %28 = arith.subf %27, %20 : vector<1x32xf32>
    %29 = arith.mulf %28, %26 : vector<1x32xf32>
    %30 = arith.mulf %20, %7 : vector<1x32xf32>
    %31 = arith.addf %29, %30 : vector<1x32xf32>
    %32 = vector.extract_strided_slice %5 {offsets = [1, 0], sizes = [1, 128], strides = [1, 1]} : vector<8x128xf32> to vector<1x128xf32>
    %c0_14 = arith.constant 0 : index
    %c0_15 = arith.constant 0 : index
    %33 = vector.load %arg2[%c0_14, %c0_15] : memref<32x128xf32, #tpu.memory_space<vmem>>, vector<32x128xf32>
    %cst_16 = arith.constant dense<0.000000e+00> : vector<1x128xf32>
    %34 = tpu.matmul %31, %33, %cst_16 {dimension_numbers = #tpu.dot_dimension_numbers<[1], [0], [0], [1], [0, 0, 1, 1], [], []>} : vector<1x32xf32>, vector<32x128xf32>, vector<1x128xf32> -> vector<1x128xf32>
    %35 = vector.extract_strided_slice %32 {offsets = [0, 0], sizes = [1, 64], strides = [1, 1]} : vector<1x128xf32> to vector<1x64xf32>
    %36 = vector.extract_strided_slice %34 {offsets = [0, 0], sizes = [1, 64], strides = [1, 1]} : vector<1x128xf32> to vector<1x64xf32>
    %37 = arith.addf %35, %36 : vector<1x64xf32>
    %38 = arith.negf %37 : vector<1x64xf32>
    %39 = math.exp %38 : vector<1x64xf32>
    %cst_17 = arith.constant 1.000000e+00 : f32
    %40 = vector.broadcast %cst_17 : f32 to vector<1x64xf32>
    %41 = arith.addf %40, %39 : vector<1x64xf32>
    %42 = arith.divf %40, %41 : vector<1x64xf32>
    %43 = vector.extract_strided_slice %42 {offsets = [0, 0], sizes = [1, 32], strides = [1, 1]} : vector<1x64xf32> to vector<1x32xf32>
    %44 = vector.extract_strided_slice %42 {offsets = [0, 32], sizes = [1, 32], strides = [1, 1]} : vector<1x64xf32> to vector<1x32xf32>
    %45 = vector.extract_strided_slice %32 {offsets = [0, 64], sizes = [1, 32], strides = [1, 1]} : vector<1x128xf32> to vector<1x32xf32>
    %46 = vector.extract_strided_slice %34 {offsets = [0, 64], sizes = [1, 32], strides = [1, 1]} : vector<1x128xf32> to vector<1x32xf32>
    %47 = arith.addf %46, %6 : vector<1x32xf32>
    %48 = arith.mulf %43, %47 : vector<1x32xf32>
    %49 = arith.addf %45, %48 : vector<1x32xf32>
    %50 = math.tanh %49 : vector<1x32xf32>
    %cst_18 = arith.constant 1.000000e+00 : f32
    %51 = vector.broadcast %cst_18 : f32 to vector<1x32xf32>
    %52 = arith.subf %51, %44 : vector<1x32xf32>
    %53 = arith.mulf %52, %50 : vector<1x32xf32>
    %54 = arith.mulf %44, %31 : vector<1x32xf32>
    %55 = arith.addf %53, %54 : vector<1x32xf32>
    %56 = vector.extract_strided_slice %5 {offsets = [2, 0], sizes = [1, 128], strides = [1, 1]} : vector<8x128xf32> to vector<1x128xf32>
    %c0_19 = arith.constant 0 : index
    %c0_20 = arith.constant 0 : index
    %57 = vector.load %arg2[%c0_19, %c0_20] : memref<32x128xf32, #tpu.memory_space<vmem>>, vector<32x128xf32>
    %cst_21 = arith.constant dense<0.000000e+00> : vector<1x128xf32>
    %58 = tpu.matmul %55, %57, %cst_21 {dimension_numbers = #tpu.dot_dimension_numbers<[1], [0], [0], [1], [0, 0, 1, 1], [], []>} : vector<1x32xf32>, vector<32x128xf32>, vector<1x128xf32> -> vector<1x128xf32>
    %59 = vector.extract_strided_slice %56 {offsets = [0, 0], sizes = [1, 64], strides = [1, 1]} : vector<1x128xf32> to vector<1x64xf32>
    %60 = vector.extract_strided_slice %58 {offsets = [0, 0], sizes = [1, 64], strides = [1, 1]} : vector<1x128xf32> to vector<1x64xf32>
    %61 = arith.addf %59, %60 : vector<1x64xf32>
    %62 = arith.negf %61 : vector<1x64xf32>
    %63 = math.exp %62 : vector<1x64xf32>
    %cst_22 = arith.constant 1.000000e+00 : f32
    %64 = vector.broadcast %cst_22 : f32 to vector<1x64xf32>
    %65 = arith.addf %64, %63 : vector<1x64xf32>
    %66 = arith.divf %64, %65 : vector<1x64xf32>
    %67 = vector.extract_strided_slice %66 {offsets = [0, 0], sizes = [1, 32], strides = [1, 1]} : vector<1x64xf32> to vector<1x32xf32>
    %68 = vector.extract_strided_slice %66 {offsets = [0, 32], sizes = [1, 32], strides = [1, 1]} : vector<1x64xf32> to vector<1x32xf32>
    %69 = vector.extract_strided_slice %56 {offsets = [0, 64], sizes = [1, 32], strides = [1, 1]} : vector<1x128xf32> to vector<1x32xf32>
    %70 = vector.extract_strided_slice %58 {offsets = [0, 64], sizes = [1, 32], strides = [1, 1]} : vector<1x128xf32> to vector<1x32xf32>
    %71 = arith.addf %70, %6 : vector<1x32xf32>
    %72 = arith.mulf %67, %71 : vector<1x32xf32>
    %73 = arith.addf %69, %72 : vector<1x32xf32>
    %74 = math.tanh %73 : vector<1x32xf32>
    %cst_23 = arith.constant 1.000000e+00 : f32
    %75 = vector.broadcast %cst_23 : f32 to vector<1x32xf32>
    %76 = arith.subf %75, %68 : vector<1x32xf32>
    %77 = arith.mulf %76, %74 : vector<1x32xf32>
    %78 = arith.mulf %68, %55 : vector<1x32xf32>
    %79 = arith.addf %77, %78 : vector<1x32xf32>
    %80 = vector.extract_strided_slice %5 {offsets = [3, 0], sizes = [1, 128], strides = [1, 1]} : vector<8x128xf32> to vector<1x128xf32>
    %c0_24 = arith.constant 0 : index
    %c0_25 = arith.constant 0 : index
    %81 = vector.load %arg2[%c0_24, %c0_25] : memref<32x128xf32, #tpu.memory_space<vmem>>, vector<32x128xf32>
    %cst_26 = arith.constant dense<0.000000e+00> : vector<1x128xf32>
    %82 = tpu.matmul %79, %81, %cst_26 {dimension_numbers = #tpu.dot_dimension_numbers<[1], [0], [0], [1], [0, 0, 1, 1], [], []>} : vector<1x32xf32>, vector<32x128xf32>, vector<1x128xf32> -> vector<1x128xf32>
    %83 = vector.extract_strided_slice %80 {offsets = [0, 0], sizes = [1, 64], strides = [1, 1]} : vector<1x128xf32> to vector<1x64xf32>
    %84 = vector.extract_strided_slice %82 {offsets = [0, 0], sizes = [1, 64], strides = [1, 1]} : vector<1x128xf32> to vector<1x64xf32>
    %85 = arith.addf %83, %84 : vector<1x64xf32>
    %86 = arith.negf %85 : vector<1x64xf32>
    %87 = math.exp %86 : vector<1x64xf32>
    %cst_27 = arith.constant 1.000000e+00 : f32
    %88 = vector.broadcast %cst_27 : f32 to vector<1x64xf32>
    %89 = arith.addf %88, %87 : vector<1x64xf32>
    %90 = arith.divf %88, %89 : vector<1x64xf32>
    %91 = vector.extract_strided_slice %90 {offsets = [0, 0], sizes = [1, 32], strides = [1, 1]} : vector<1x64xf32> to vector<1x32xf32>
    %92 = vector.extract_strided_slice %90 {offsets = [0, 32], sizes = [1, 32], strides = [1, 1]} : vector<1x64xf32> to vector<1x32xf32>
    %93 = vector.extract_strided_slice %80 {offsets = [0, 64], sizes = [1, 32], strides = [1, 1]} : vector<1x128xf32> to vector<1x32xf32>
    %94 = vector.extract_strided_slice %82 {offsets = [0, 64], sizes = [1, 32], strides = [1, 1]} : vector<1x128xf32> to vector<1x32xf32>
    %95 = arith.addf %94, %6 : vector<1x32xf32>
    %96 = arith.mulf %91, %95 : vector<1x32xf32>
    %97 = arith.addf %93, %96 : vector<1x32xf32>
    %98 = math.tanh %97 : vector<1x32xf32>
    %cst_28 = arith.constant 1.000000e+00 : f32
    %99 = vector.broadcast %cst_28 : f32 to vector<1x32xf32>
    %100 = arith.subf %99, %92 : vector<1x32xf32>
    %101 = arith.mulf %100, %98 : vector<1x32xf32>
    %102 = arith.mulf %92, %79 : vector<1x32xf32>
    %103 = arith.addf %101, %102 : vector<1x32xf32>
    %104 = vector.extract_strided_slice %5 {offsets = [4, 0], sizes = [1, 128], strides = [1, 1]} : vector<8x128xf32> to vector<1x128xf32>
    %c0_29 = arith.constant 0 : index
    %c0_30 = arith.constant 0 : index
    %105 = vector.load %arg2[%c0_29, %c0_30] : memref<32x128xf32, #tpu.memory_space<vmem>>, vector<32x128xf32>
    %cst_31 = arith.constant dense<0.000000e+00> : vector<1x128xf32>
    %106 = tpu.matmul %103, %105, %cst_31 {dimension_numbers = #tpu.dot_dimension_numbers<[1], [0], [0], [1], [0, 0, 1, 1], [], []>} : vector<1x32xf32>, vector<32x128xf32>, vector<1x128xf32> -> vector<1x128xf32>
    %107 = vector.extract_strided_slice %104 {offsets = [0, 0], sizes = [1, 64], strides = [1, 1]} : vector<1x128xf32> to vector<1x64xf32>
    %108 = vector.extract_strided_slice %106 {offsets = [0, 0], sizes = [1, 64], strides = [1, 1]} : vector<1x128xf32> to vector<1x64xf32>
    %109 = arith.addf %107, %108 : vector<1x64xf32>
    %110 = arith.negf %109 : vector<1x64xf32>
    %111 = math.exp %110 : vector<1x64xf32>
    %cst_32 = arith.constant 1.000000e+00 : f32
    %112 = vector.broadcast %cst_32 : f32 to vector<1x64xf32>
    %113 = arith.addf %112, %111 : vector<1x64xf32>
    %114 = arith.divf %112, %113 : vector<1x64xf32>
    %115 = vector.extract_strided_slice %114 {offsets = [0, 0], sizes = [1, 32], strides = [1, 1]} : vector<1x64xf32> to vector<1x32xf32>
    %116 = vector.extract_strided_slice %114 {offsets = [0, 32], sizes = [1, 32], strides = [1, 1]} : vector<1x64xf32> to vector<1x32xf32>
    %117 = vector.extract_strided_slice %104 {offsets = [0, 64], sizes = [1, 32], strides = [1, 1]} : vector<1x128xf32> to vector<1x32xf32>
    %118 = vector.extract_strided_slice %106 {offsets = [0, 64], sizes = [1, 32], strides = [1, 1]} : vector<1x128xf32> to vector<1x32xf32>
    %119 = arith.addf %118, %6 : vector<1x32xf32>
    %120 = arith.mulf %115, %119 : vector<1x32xf32>
    %121 = arith.addf %117, %120 : vector<1x32xf32>
    %122 = math.tanh %121 : vector<1x32xf32>
    %cst_33 = arith.constant 1.000000e+00 : f32
    %123 = vector.broadcast %cst_33 : f32 to vector<1x32xf32>
    %124 = arith.subf %123, %116 : vector<1x32xf32>
    %125 = arith.mulf %124, %122 : vector<1x32xf32>
    %126 = arith.mulf %116, %103 : vector<1x32xf32>
    %127 = arith.addf %125, %126 : vector<1x32xf32>
    %128 = vector.extract_strided_slice %5 {offsets = [5, 0], sizes = [1, 128], strides = [1, 1]} : vector<8x128xf32> to vector<1x128xf32>
    %c0_34 = arith.constant 0 : index
    %c0_35 = arith.constant 0 : index
    %129 = vector.load %arg2[%c0_34, %c0_35] : memref<32x128xf32, #tpu.memory_space<vmem>>, vector<32x128xf32>
    %cst_36 = arith.constant dense<0.000000e+00> : vector<1x128xf32>
    %130 = tpu.matmul %127, %129, %cst_36 {dimension_numbers = #tpu.dot_dimension_numbers<[1], [0], [0], [1], [0, 0, 1, 1], [], []>} : vector<1x32xf32>, vector<32x128xf32>, vector<1x128xf32> -> vector<1x128xf32>
    %131 = vector.extract_strided_slice %128 {offsets = [0, 0], sizes = [1, 64], strides = [1, 1]} : vector<1x128xf32> to vector<1x64xf32>
    %132 = vector.extract_strided_slice %130 {offsets = [0, 0], sizes = [1, 64], strides = [1, 1]} : vector<1x128xf32> to vector<1x64xf32>
    %133 = arith.addf %131, %132 : vector<1x64xf32>
    %134 = arith.negf %133 : vector<1x64xf32>
    %135 = math.exp %134 : vector<1x64xf32>
    %cst_37 = arith.constant 1.000000e+00 : f32
    %136 = vector.broadcast %cst_37 : f32 to vector<1x64xf32>
    %137 = arith.addf %136, %135 : vector<1x64xf32>
    %138 = arith.divf %136, %137 : vector<1x64xf32>
    %139 = vector.extract_strided_slice %138 {offsets = [0, 0], sizes = [1, 32], strides = [1, 1]} : vector<1x64xf32> to vector<1x32xf32>
    %140 = vector.extract_strided_slice %138 {offsets = [0, 32], sizes = [1, 32], strides = [1, 1]} : vector<1x64xf32> to vector<1x32xf32>
    %141 = vector.extract_strided_slice %128 {offsets = [0, 64], sizes = [1, 32], strides = [1, 1]} : vector<1x128xf32> to vector<1x32xf32>
    %142 = vector.extract_strided_slice %130 {offsets = [0, 64], sizes = [1, 32], strides = [1, 1]} : vector<1x128xf32> to vector<1x32xf32>
    %143 = arith.addf %142, %6 : vector<1x32xf32>
    %144 = arith.mulf %139, %143 : vector<1x32xf32>
    %145 = arith.addf %141, %144 : vector<1x32xf32>
    %146 = math.tanh %145 : vector<1x32xf32>
    %cst_38 = arith.constant 1.000000e+00 : f32
    %147 = vector.broadcast %cst_38 : f32 to vector<1x32xf32>
    %148 = arith.subf %147, %140 : vector<1x32xf32>
    %149 = arith.mulf %148, %146 : vector<1x32xf32>
    %150 = arith.mulf %140, %127 : vector<1x32xf32>
    %151 = arith.addf %149, %150 : vector<1x32xf32>
    %152 = vector.extract_strided_slice %5 {offsets = [6, 0], sizes = [1, 128], strides = [1, 1]} : vector<8x128xf32> to vector<1x128xf32>
    %c0_39 = arith.constant 0 : index
    %c0_40 = arith.constant 0 : index
    %153 = vector.load %arg2[%c0_39, %c0_40] : memref<32x128xf32, #tpu.memory_space<vmem>>, vector<32x128xf32>
    %cst_41 = arith.constant dense<0.000000e+00> : vector<1x128xf32>
    %154 = tpu.matmul %151, %153, %cst_41 {dimension_numbers = #tpu.dot_dimension_numbers<[1], [0], [0], [1], [0, 0, 1, 1], [], []>} : vector<1x32xf32>, vector<32x128xf32>, vector<1x128xf32> -> vector<1x128xf32>
    %155 = vector.extract_strided_slice %152 {offsets = [0, 0], sizes = [1, 64], strides = [1, 1]} : vector<1x128xf32> to vector<1x64xf32>
    %156 = vector.extract_strided_slice %154 {offsets = [0, 0], sizes = [1, 64], strides = [1, 1]} : vector<1x128xf32> to vector<1x64xf32>
    %157 = arith.addf %155, %156 : vector<1x64xf32>
    %158 = arith.negf %157 : vector<1x64xf32>
    %159 = math.exp %158 : vector<1x64xf32>
    %cst_42 = arith.constant 1.000000e+00 : f32
    %160 = vector.broadcast %cst_42 : f32 to vector<1x64xf32>
    %161 = arith.addf %160, %159 : vector<1x64xf32>
    %162 = arith.divf %160, %161 : vector<1x64xf32>
    %163 = vector.extract_strided_slice %162 {offsets = [0, 0], sizes = [1, 32], strides = [1, 1]} : vector<1x64xf32> to vector<1x32xf32>
    %164 = vector.extract_strided_slice %162 {offsets = [0, 32], sizes = [1, 32], strides = [1, 1]} : vector<1x64xf32> to vector<1x32xf32>
    %165 = vector.extract_strided_slice %152 {offsets = [0, 64], sizes = [1, 32], strides = [1, 1]} : vector<1x128xf32> to vector<1x32xf32>
    %166 = vector.extract_strided_slice %154 {offsets = [0, 64], sizes = [1, 32], strides = [1, 1]} : vector<1x128xf32> to vector<1x32xf32>
    %167 = arith.addf %166, %6 : vector<1x32xf32>
    %168 = arith.mulf %163, %167 : vector<1x32xf32>
    %169 = arith.addf %165, %168 : vector<1x32xf32>
    %170 = math.tanh %169 : vector<1x32xf32>
    %cst_43 = arith.constant 1.000000e+00 : f32
    %171 = vector.broadcast %cst_43 : f32 to vector<1x32xf32>
    %172 = arith.subf %171, %164 : vector<1x32xf32>
    %173 = arith.mulf %172, %170 : vector<1x32xf32>
    %174 = arith.mulf %164, %151 : vector<1x32xf32>
    %175 = arith.addf %173, %174 : vector<1x32xf32>
    %176 = vector.extract_strided_slice %5 {offsets = [7, 0], sizes = [1, 128], strides = [1, 1]} : vector<8x128xf32> to vector<1x128xf32>
    %c0_44 = arith.constant 0 : index
    %c0_45 = arith.constant 0 : index
    %177 = vector.load %arg2[%c0_44, %c0_45] : memref<32x128xf32, #tpu.memory_space<vmem>>, vector<32x128xf32>
    %cst_46 = arith.constant dense<0.000000e+00> : vector<1x128xf32>
    %178 = tpu.matmul %175, %177, %cst_46 {dimension_numbers = #tpu.dot_dimension_numbers<[1], [0], [0], [1], [0, 0, 1, 1], [], []>} : vector<1x32xf32>, vector<32x128xf32>, vector<1x128xf32> -> vector<1x128xf32>
    %179 = vector.extract_strided_slice %176 {offsets = [0, 0], sizes = [1, 64], strides = [1, 1]} : vector<1x128xf32> to vector<1x64xf32>
    %180 = vector.extract_strided_slice %178 {offsets = [0, 0], sizes = [1, 64], strides = [1, 1]} : vector<1x128xf32> to vector<1x64xf32>
    %181 = arith.addf %179, %180 : vector<1x64xf32>
    %182 = arith.negf %181 : vector<1x64xf32>
    %183 = math.exp %182 : vector<1x64xf32>
    %cst_47 = arith.constant 1.000000e+00 : f32
    %184 = vector.broadcast %cst_47 : f32 to vector<1x64xf32>
    %185 = arith.addf %184, %183 : vector<1x64xf32>
    %186 = arith.divf %184, %185 : vector<1x64xf32>
    %187 = vector.extract_strided_slice %186 {offsets = [0, 0], sizes = [1, 32], strides = [1, 1]} : vector<1x64xf32> to vector<1x32xf32>
    %188 = vector.extract_strided_slice %186 {offsets = [0, 32], sizes = [1, 32], strides = [1, 1]} : vector<1x64xf32> to vector<1x32xf32>
    %189 = vector.extract_strided_slice %176 {offsets = [0, 64], sizes = [1, 32], strides = [1, 1]} : vector<1x128xf32> to vector<1x32xf32>
    %190 = vector.extract_strided_slice %178 {offsets = [0, 64], sizes = [1, 32], strides = [1, 1]} : vector<1x128xf32> to vector<1x32xf32>
    %191 = arith.addf %190, %6 : vector<1x32xf32>
    %192 = arith.mulf %187, %191 : vector<1x32xf32>
    %193 = arith.addf %189, %192 : vector<1x32xf32>
    %194 = math.tanh %193 : vector<1x32xf32>
    %cst_48 = arith.constant 1.000000e+00 : f32
    %195 = vector.broadcast %cst_48 : f32 to vector<1x32xf32>
    %196 = arith.subf %195, %188 : vector<1x32xf32>
    %197 = arith.mulf %196, %194 : vector<1x32xf32>
    %198 = arith.mulf %188, %175 : vector<1x32xf32>
    %199 = arith.addf %197, %198 : vector<1x32xf32>
    %c0_49 = arith.constant 0 : index
    %c0_50 = arith.constant 0 : index
    %200 = vector.load %arg6[%c0_49, %c0_50] : memref<1x32xf32, #tpu.memory_space<vmem>>, vector<1x32xf32>
    tpu.vector_store %arg6[%c0_49, %c0_50], %199 {strides = array<i32>} : memref<1x32xf32, #tpu.memory_space<vmem>>, vector<1x32xf32>,
    return
  }
}

</mosaic_0001>

<bundles_post_ra>
// kernel: tpu_custom_call.1
= control target key start
LH: loop header
LB: loop body
LE: loop exit
PB: predicated region body
PF: predicated region fallthrough
CT: control target
= control target key end

     0   :  { %11 = vsyncpa [#allocation3], 0  ;;  %s1583_s0 = inlined_call_operand.vmem [shape: f32[8,16], index: 0, kind: input, shape index: {}]   ;;  %s1584_s1 = inlined_call_operand.hbm [shape: f32[16,128], index: 1, kind: input, shape index: {}]   ;;  %s1585_s2 = inlined_call_operand.hbm [shape: f32[32,128], index: 2, kind: input, shape index: {}]   ;;  %s1586_s3 = inlined_call_operand.vmem [shape: f32[1,128], index: 3, kind: input, shape index: {}]   ;;  %s1587_s4 = inlined_call_operand.vmem [shape: f32[1,32], index: 4, kind: input, shape index: {}]   ;;  %s1588_s5 = inlined_call_operand.hbm [shape: f32[1,32], index: 5, kind: input, shape index: {}, may-alias: {5,6}]   ;;  %s1589_s6 = inlined_call_operand.hbm [shape: f32[1,32], index: 6, kind: output, shape index: {}, may-alias: {5,6}]  }
   0x1   :  { %12 = vsyncpa [#allocation6], 0 }
   0x2   :  { %13 = vsyncpa [#allocation4], 0  ;;  %s1355_s21 = smov [#allocation5]   ;;  %s1356_s23 = smov [#allocation2]  }
   0x3   :  { %s33_s22 = sshll.u32 %s1355_s21, 4  ;;  %s21_s24 = sshll.u32 %s1356_s23, 4  ;;  %s34_s22 = int_to_ptr.vmem [resolvable:$true] %s33_s22  ;;  %s22_s24 = int_to_ptr.vmem [resolvable:$true] %s21_s24 }
   0x4   :  { %s1277_s25 = scalar_lea.vmem %s34_s22, 512  ;;  %p1282_p1 = scmp.lt.s32.totalorder %s34_s22, %s34_s22 }
   0x5   :  { %p1278_p0 = scmp.ne.s32.totalorder %s34_s22, %s1277_s25  ;;  %p1283_p2 = scmp.lt.s32.totalorder %s1277_s25, %s1277_s25 }
   0x7   :  { %p1284_p3 = por %p1283_p2, %p1282_p1 }
   0x9   :  { %p1285_p4 = pnand %p1284_p3, %p1278_p0 }
   0xb   :  { %1288 = shalt.err (!%p1285_p4)
}
   0xc   :  { %s1357_s26 = smov 128   ;;  %s1358_s27 = smov 8  }
   0xd   :  { %39 = dma.hbm_to_vmem [thread:$0]  %s1585_s2, 512, %s34_s22, [#allocation6], %s1357_s26, %s1357_s26, %s1358_s27  }
   0xe   :  { %s1297_s30 = scalar_lea.vmem %s22_s24, 256  ;;  %p1302_p6 = scmp.lt.s32.totalorder %s22_s24, %s22_s24 }
   0xf   :  { %p1298_p5 = scmp.ne.s32.totalorder %s22_s24, %s1297_s30  ;;  %p1303_p7 = scmp.lt.s32.totalorder %s1297_s30, %s1297_s30 }
  0x11   :  { %p1304_p8 = por %p1303_p7, %p1302_p6 }
  0x13   :  { %p1305_p9 = pnand %p1304_p8, %p1298_p5 }
  0x15   :  { %1308 = shalt.err (!%p1305_p9)
}
  0x16   :  { %27 = dma.hbm_to_vmem [thread:$0]  %s1584_s1, 256, %s22_s24, [#allocation3], %s1357_s26, %s1357_s26, %s1358_s27  }
  0x17   :  { %s1359_s9 = smov [#allocation7]  }
  0x18   :  { %s50_s10 = sshll.u32 %s1359_s9, 4  ;;  %s51_s10 = int_to_ptr.vmem [resolvable:$true] %s50_s10 }
  0x19   :  { %s1317_s11 = scalar_lea.vmem %s51_s10, 16  ;;  %s1321_s12 = scalar_lea.vmem %s51_s10, 32 }
  0x1a   :  { %p1318_p10 = scmp.ne.s32.totalorder %s51_s10, %s1317_s11  ;;  %p1322_p11 = scmp.lt.s32.totalorder %s51_s10, %s51_s10 }
  0x1b   :  { %p1323_p12 = scmp.lt.s32.totalorder %s1321_s12, %s1317_s11 }
  0x1d   :  { %p1324_p13 = por %p1323_p12, %p1322_p11 }
  0x1f   :  { %p1325_p0 = pnand %p1324_p13, %p1318_p10 }
  0x21   :  { %1328 = shalt.err (!%p1325_p0)
}
  0x22   :  { %53 = dma.hbm_to_vmem [thread:$0]  %s1588_s5, 16, %s51_s10, [#allocation6]  }
  0x23   :  { %1349 = dma.done.wait [#allocation3], 256  }
  0x24   :  { %1350 = vsyncadd [#allocation3], 4294967040 }
  0x25   :  { %1351 = dma.done.wait [#allocation6], 528  }
  0x26   :  { %1352 = vsyncadd [#allocation6], 4294966768  ;;  %v1360_v0 = vmov 0.0   ;;  %vm1361_vm0 = vmmov 0   ;;  %v1416_v1 = vld [vmem:[#allocation5 + $0x18] sm:$0xff]  ;;  %v1418_v3 = vld [vmem:[#allocation5 + $0x10] sm:$0xff]  ;;  %v260_v10 = vlaneseq }
  0x27   :  { %1122 = vmatprep.subr.mxu1 %v1360_v0  ;;  %1115 = vmatprep.subr.mxu0 %v1360_v0  ;;  %v65_v2 = vld [vmem:[#allocation2 + $0x8] sm:$0xff]  ;;  %v64_v4 = vld [vmem:[#allocation2] sm:$0xff]  ;;  %vm73_vm1 = vcmask 130048   ;;  %v1426_v6 = vld [vmem:[#allocation5 + $0x8] sm:$0xff]  ;;  %vm153_vm2 = vcmask 261120   ;;  %s1365_s18 = smov [#allocation8]  }
  0x28   :  { %1119 = vmatprep.mubr.msk.f32.mxu0 %vm1361_vm0, %v1360_v0  ;;  %1130 = vmatprep.mubr.msk.f32.mxu1 %vm1361_vm0, %v1360_v0  ;;  %v63_v5 = vld [vmem:[%s1583_s0] sm:$0xff]  ;;  %v1433_v8 = vld [vmem:[#allocation5] sm:$0xff]  ;;  %s1362_s0 = smov 64   ;;  %v261_v11 = vshrl.u32 %v260_v10, 7  ;;  %s1043_s19 = sshll.u32 %s1365_s18, 4  ;;  %vm1035_vm3 = vcmask 261127   ;;  %s1044_s19 = int_to_ptr.vmem [resolvable:$true] %s1043_s19 }
  0x29   :  { %1123 = vmatpush3.msra.mxu1 %v1416_v1  ;;  %1116 = vmatpush3.msra.mxu0 %v65_v2  ;;  %v1057_v7 = vld [vmem:[%s1587_s4] ss:$0 sm:$0xff]  ;;  %v148_v9 = vld [vmem:[#allocation7] sm:$0x1]  ;;  %s1363_s4 = smov 32   ;;  %s1329_s20 = scalar_lea.vmem %s1044_s19, 16 }
  0x2a   :  { %1124 = vmatprep.subr.mxu1 %v1360_v0  ;;  %1117 = vmatprep.subr.mxu0 %v1360_v0  ;;  %v262_v15 = vsub.s32 0, %v261_v11  ;;  %v1053_v20 = vld [vmem:[%s1586_s3] ss:$0 sm:$0xff]  ;;  %s1364_s3 = smov 96   ;;  %p1330_p1 = scmp.ne.s32.totalorder %s1044_s19, %s1329_s20 }
  0x2b   :  { %1125 = vmatpush3.msra.mxu1 %v1418_v3  ;;  %1118 = vmatpush3.msra.mxu0 %v64_v4  ;;  %s1333_s21 = scalar_lea.vmem %s1044_s19, 32  ;;  %p1334_p2 = scmp.lt.s32.totalorder %s1044_s19, %s1044_s19 }
  0x2c   :  { %1126 = vmatprep.subr.mxu1 %v1360_v0  ;;  %1120 = vmatmul.mubr.msk.f32.vlgmr.msra.gmra.mxu0 %vm73_vm1, %v63_v5  ;;  %v263_v19 = vrot.slane %v148_v9, %v262_v15  ;;  %p1335_p3 = scmp.lt.s32.totalorder %s1333_s21, %s1329_s20 }
  0x2d   :  { %1127 = vmatpush3.msra.mxu1 %v1426_v6  ;;  %239 = vrot.lane.b32.xlu0 %v1057_v7, %s1362_s0 }
  0x2e   :  { %1128 = vmatprep.subr.mxu1 %v1360_v0  ;;  %1133 = vmatprep.subr.mxu0 %v1360_v0  ;;  %p1336_p4 = por %p1335_p3, %p1334_p2 }
  0x2f   :  { %1129 = vmatpush3.msra.mxu1 %v1433_v8  ;;  %1134 = vmatpush3.msra.mxu0 %v1416_v1 }
  0x30   :  { %1131 = vmatmul.mubr.msk.f32.vlgmr.msra.gmra.mxu1 %vm153_vm2, %v148_v9  ;;  %1135 = vmatprep.subr.mxu0 %v1360_v0  ;;  %p1337_p5 = pnand %p1336_p4, %p1330_p1 }
  0x31   :  { %1136 = vmatpush3.msra.mxu0 %v1418_v3  ;;  %1141 = vmatprep.mubr.msk.f32.mxu0 %vm1361_vm0, %v1360_v0 }
  0x32   :  { %1137 = vmatprep.subr.mxu0 %v1360_v0  ;;  %1144 = vmatprep.subr.mxu1 %v1360_v0 }
  0x33   :  { %1138 = vmatpush3.msra.mxu0 %v1426_v6  ;;  %1145 = vmatpush3.msra.mxu1 %v1416_v1 }
  0x34   :  { %1139 = vmatprep.subr.mxu0 %v1360_v0  ;;  %1146 = vmatprep.subr.mxu1 %v1360_v0 }
  0x35   :  { %1140 = vmatpush3.msra.mxu0 %v1433_v8  ;;  %1147 = vmatpush3.msra.mxu1 %v1418_v3 }
  0x36   :  { %1148 = vmatprep.subr.mxu1 %v1360_v0  ;;  %1152 = vmatprep.mubr.msk.f32.mxu1 %vm1361_vm0, %v1360_v0 }
  0x37   :  { %1149 = vmatpush3.msra.mxu1 %v1426_v6  ;;  %1155 = vmatprep.subr.mxu0 %v1360_v0 }
  0x38   :  { %1150 = vmatprep.subr.mxu1 %v1360_v0 }
  0x39   :  { %1151 = vmatpush3.msra.mxu1 %v1433_v8 }
  0x3a   :  { %1166 = vmatprep.subr.mxu1 %v1360_v0 }
  0x9f   :  { %v1462_v13 = vpop.permute.xlu0 %239 }
  0xec   :  { %v143_v12 = vpop.f32.mrf.mxu0 }
  0xed   :  { %v1469_v21 = vadd.f32 %v1053_v20, %v143_v12 }
  0xee   :  { %v1121_v14 = vpop.f32.mrf.mxu0 }
  0xf0   :  { %v223_v16 = vpop.f32.mrf.mxu1 }
  0xf1   :  { %v242_v17 = vadd.f32 %v1462_v13, %v223_v16  ;;  %v227_v22 = vadd.f32 %v223_v16, %v1469_v21 }
  0xf2   :  { %v1132_v18 = vpop.f32.mrf.mxu1 }
  0xf3   :  { %244 = vrot.lane.b32.xlu0 %v242_v17, %s1362_s0  ;;  %v1056_v23 = vmul.f32 -1.442695, %v227_v22 }
  0xf5   :  { %1221 = vpow2.f32 %v1056_v23 }
  0xf7   :  { %264 = vrot.lane.b32.xlu0 %v263_v19, %s1363_s4 }
 0x102   :  { %v1222_v24 = vpop.eup %1221 }
 0x103   :  { %v231_v25 = vadd.f32 1.0, %v1222_v24 }
 0x105   :  { %1223 = vrcp.f32 %v231_v25 }
 0x112   :  { %v1224_v26 = vpop.eup %1223 }
 0x113   :  { %v254_v33 = vsub.f32 1.0, %v1224_v26 }
 0x165   :  { %v245_v27 = vpop.permute.xlu0 %244 }
 0x166   :  { %v247_v28 = vmul.f32 %v1224_v26, %v245_v27 }
 0x168   :  { %249 = vrot.lane.b32.xlu1 %v247_v28, %s1362_s0 }
 0x169   :  { %v265_v32 = vpop.permute.xlu0 %264 }
 0x16a   :  { %v267_v35 = vmul.f32 %v1224_v26, %v265_v32 }
 0x1da   :  { %v250_v29 = vpop.permute.xlu1 %249 }
 0x1db   :  { %v252_v30 = vadd.f32 %v250_v29, %v1469_v21 }
 0x1dd   :  { %1225 = vtanh.f32 %v252_v30 }
 0x1ea   :  { %v1226_v31 = vpop.eup %1225 }
 0x1eb   :  { %256 = vrot.lane.b32.xlu1 %v1226_v31, %s1364_s3 }
 0x25d   :  { %v257_v34 = vpop.permute.xlu1 %256 }
 0x25e   :  { %v259_v36 = vmul.f32 %v257_v34, %v254_v33 }
 0x260   :  { %v268_v37 = vadd.f32 %v267_v35, %v259_v36 }
 0x262   :  { %270 = vrot.lane.b32.xlu1 %v268_v37, %s1364_s3  ;;  %v373_v54 = vrot.slane %v268_v37, 7 }
 0x2d4   :  { %v271_v38 = vpop.permute.xlu1 %270 }
 0x2d5   :  { %1142 = vmatmul.mubr.msk.f32.vlgmr.msra.gmra.mxu0 %vm153_vm2, %v271_v38 }
 0x2d6   :  { %1156 = vmatpush3.msra.mxu0 %v1416_v1  ;;  %1163 = vmatprep.mubr.msk.f32.mxu0 %vm1361_vm0, %v1360_v0 }
 0x2d7   :  { %1157 = vmatprep.subr.mxu0 %v1360_v0 }
 0x2d8   :  { %1158 = vmatpush3.msra.mxu0 %v1418_v3 }
 0x2d9   :  { %1159 = vmatprep.subr.mxu0 %v1360_v0 }
 0x2da   :  { %1160 = vmatpush3.msra.mxu0 %v1426_v6 }
 0x2db   :  { %1161 = vmatprep.subr.mxu0 %v1360_v0 }
 0x2dc   :  { %1162 = vmatpush3.msra.mxu0 %v1433_v8 }
 0x2dd   :  { %1177 = vmatprep.subr.mxu0 %v1360_v0 }
 0x395   :  { %v340_v39 = vpop.f32.mrf.mxu0 }
 0x396   :  { %v354_v40 = vadd.f32 %v340_v39, %v1462_v13  ;;  %v345_v43 = vrot.slane %v340_v39, 7 }
 0x397   :  { %v1143_v41 = vpop.f32.mrf.mxu0 }
 0x398   :  { %v356_v42 = vrot.slane %v354_v40, 7  ;;  %v347_v44 = vadd.f32 %v345_v43, %v1469_v21 }
 0x39a   :  { %357 = vrot.lane.b32.xlu0 %v356_v42, %s1362_s0  ;;  %v1059_v45 = vmul.f32 -1.442695, %v347_v44 }
 0x39c   :  { %1227 = vpow2.f32 %v1059_v45 }
 0x3a9   :  { %v1228_v46 = vpop.eup %1227 }
 0x3aa   :  { %v351_v47 = vadd.f32 1.0, %v1228_v46 }
 0x3ac   :  { %1229 = vrcp.f32 %v351_v47 }
 0x3b9   :  { %v1230_v48 = vpop.eup %1229 }
 0x3ba   :  { %v367_v55 = vsub.f32 1.0, %v1230_v48  ;;  %v375_v57 = vmul.f32 %v1230_v48, %v373_v54 }
 0x40c   :  { %v358_v49 = vpop.permute.xlu0 %357 }
 0x40d   :  { %v360_v50 = vmul.f32 %v1230_v48, %v358_v49 }
 0x40f   :  { %362 = vrot.lane.b32.xlu1 %v360_v50, %s1362_s0 }
 0x481   :  { %v363_v51 = vpop.permute.xlu1 %362 }
 0x482   :  { %v365_v52 = vadd.f32 %v363_v51, %v1469_v21 }
 0x484   :  { %1231 = vtanh.f32 %v365_v52 }
 0x491   :  { %v1232_v53 = vpop.eup %1231 }
 0x492   :  { %369 = vrot.lane.b32.xlu0 %v1232_v53, %s1364_s3 }
 0x504   :  { %v370_v56 = vpop.permute.xlu0 %369 }
 0x505   :  { %v372_v58 = vmul.f32 %v370_v56, %v367_v55 }
 0x507   :  { %v376_v59 = vadd.f32 %v375_v57, %v372_v58 }
 0x509   :  { %v378_v60 = vrot.slane %v376_v59, 1  ;;  %v482_v19 = vrot.slane %v376_v59, 7 }
 0x50b   :  { %379 = vrot.lane.b32.xlu1 %v378_v60, %s1364_s3 }
 0x57d   :  { %v380_v61 = vpop.permute.xlu1 %379 }
 0x57e   :  { %1153 = vmatmul.mubr.msk.f32.vlgmr.msra.gmra.mxu1 %vm153_vm2, %v380_v61 }
 0x57f   :  { %1167 = vmatpush3.msra.mxu1 %v1416_v1  ;;  %1174 = vmatprep.mubr.msk.f32.mxu1 %vm1361_vm0, %v1360_v0 }
 0x580   :  { %1168 = vmatprep.subr.mxu1 %v1360_v0 }
 0x581   :  { %1169 = vmatpush3.msra.mxu1 %v1418_v3 }
 0x582   :  { %1170 = vmatprep.subr.mxu1 %v1360_v0 }
 0x583   :  { %1171 = vmatpush3.msra.mxu1 %v1426_v6 }
 0x584   :  { %1172 = vmatprep.subr.mxu1 %v1360_v0 }
 0x585   :  { %1173 = vmatpush3.msra.mxu1 %v1433_v8 }
 0x586   :  { %1188 = vmatprep.subr.mxu1 %v1360_v0 }
 0x63e   :  { %v449_v62 = vpop.f32.mrf.mxu1 }
 0x63f   :  { %v463_v63 = vadd.f32 %v449_v62, %v1462_v13  ;;  %v454_v5 = vrot.slane %v449_v62, 6 }
 0x640   :  { %v1154_v2 = vpop.f32.mrf.mxu1 }
 0x641   :  { %v465_v4 = vrot.slane %v463_v63, 6  ;;  %v456_v7 = vadd.f32 %v454_v5, %v1469_v21 }
 0x643   :  { %466 = vrot.lane.b32.xlu0 %v465_v4, %s1362_s0  ;;  %v1061_v9 = vmul.f32 -1.442695, %v456_v7 }
 0x645   :  { %1233 = vpow2.f32 %v1061_v9 }
 0x652   :  { %v1234_v10 = vpop.eup %1233 }
 0x653   :  { %v460_v11 = vadd.f32 1.0, %v1234_v10 }
 0x655   :  { %1235 = vrcp.f32 %v460_v11 }
 0x662   :  { %v1236_v12 = vpop.eup %1235 }
 0x663   :  { %v476_v20 = vsub.f32 1.0, %v1236_v12  ;;  %v484_v23 = vmul.f32 %v1236_v12, %v482_v19 }
 0x6b5   :  { %v467_v14 = vpop.permute.xlu0 %466 }
 0x6b6   :  { %v469_v15 = vmul.f32 %v1236_v12, %v467_v14 }
 0x6b8   :  { %471 = vrot.lane.b32.xlu1 %v469_v15, %s1362_s0 }
 0x72a   :  { %v472_v16 = vpop.permute.xlu1 %471 }
 0x72b   :  { %v474_v17 = vadd.f32 %v472_v16, %v1469_v21 }
 0x72d   :  { %1237 = vtanh.f32 %v474_v17 }
 0x73a   :  { %v1238_v18 = vpop.eup %1237 }
 0x73b   :  { %478 = vrot.lane.b32.xlu0 %v1238_v18, %s1364_s3 }
 0x7ad   :  { %v479_v22 = vpop.permute.xlu0 %478 }
 0x7ae   :  { %v481_v24 = vmul.f32 %v479_v22, %v476_v20 }
 0x7b0   :  { %v485_v25 = vadd.f32 %v484_v23, %v481_v24 }
 0x7b2   :  { %v487_v26 = vrot.slane %v485_v25, 2  ;;  %v591_v43 = vrot.slane %v485_v25, 7 }
 0x7b4   :  { %488 = vrot.lane.b32.xlu1 %v487_v26, %s1364_s3 }
 0x826   :  { %v489_v27 = vpop.permute.xlu1 %488 }
 0x827   :  { %1164 = vmatmul.mubr.msk.f32.vlgmr.msra.gmra.mxu0 %vm153_vm2, %v489_v27 }
 0x828   :  { %1178 = vmatpush3.msra.mxu0 %v1416_v1  ;;  %1185 = vmatprep.mubr.msk.f32.mxu0 %vm1361_vm0, %v1360_v0 }
 0x829   :  { %1179 = vmatprep.subr.mxu0 %v1360_v0 }
 0x82a   :  { %1180 = vmatpush3.msra.mxu0 %v1418_v3 }
 0x82b   :  { %1181 = vmatprep.subr.mxu0 %v1360_v0 }
 0x82c   :  { %1182 = vmatpush3.msra.mxu0 %v1426_v6 }
 0x82d   :  { %1183 = vmatprep.subr.mxu0 %v1360_v0 }
 0x82e   :  { %1184 = vmatpush3.msra.mxu0 %v1433_v8 }
 0x82f   :  { %1199 = vmatprep.subr.mxu0 %v1360_v0 }
 0x8e7   :  { %v558_v28 = vpop.f32.mrf.mxu0 }
 0x8e8   :  { %v572_v29 = vadd.f32 %v558_v28, %v1462_v13  ;;  %v563_v32 = vrot.slane %v558_v28, 5 }
 0x8e9   :  { %v1165_v30 = vpop.f32.mrf.mxu0 }
 0x8ea   :  { %v574_v31 = vrot.slane %v572_v29, 5  ;;  %v565_v33 = vadd.f32 %v563_v32, %v1469_v21 }
 0x8ec   :  { %575 = vrot.lane.b32.xlu0 %v574_v31, %s1362_s0  ;;  %v1063_v34 = vmul.f32 -1.442695, %v565_v33 }
 0x8ee   :  { %1239 = vpow2.f32 %v1063_v34 }
 0x8fb   :  { %v1240_v35 = vpop.eup %1239 }
 0x8fc   :  { %v569_v36 = vadd.f32 1.0, %v1240_v35 }
 0x8fe   :  { %1241 = vrcp.f32 %v569_v36 }
 0x90b   :  { %v1242_v37 = vpop.eup %1241 }
 0x90c   :  { %v585_v44 = vsub.f32 1.0, %v1242_v37  ;;  %v593_v46 = vmul.f32 %v1242_v37, %v591_v43 }
 0x95e   :  { %v576_v38 = vpop.permute.xlu0 %575 }
 0x95f   :  { %v578_v39 = vmul.f32 %v1242_v37, %v576_v38 }
 0x961   :  { %580 = vrot.lane.b32.xlu1 %v578_v39, %s1362_s0 }
 0x9d3   :  { %v581_v40 = vpop.permute.xlu1 %580 }
 0x9d4   :  { %v583_v41 = vadd.f32 %v581_v40, %v1469_v21 }
 0x9d6   :  { %1243 = vtanh.f32 %v583_v41 }
 0x9e3   :  { %v1244_v42 = vpop.eup %1243 }
 0x9e4   :  { %587 = vrot.lane.b32.xlu0 %v1244_v42, %s1364_s3 }
 0xa56   :  { %v588_v45 = vpop.permute.xlu0 %587 }
 0xa57   :  { %v590_v47 = vmul.f32 %v588_v45, %v585_v44 }
 0xa59   :  { %v594_v48 = vadd.f32 %v593_v46, %v590_v47 }
 0xa5b   :  { %v596_v49 = vrot.slane %v594_v48, 3  ;;  %v700_v5 = vrot.slane %v594_v48, 7 }
 0xa5d   :  { %597 = vrot.lane.b32.xlu1 %v596_v49, %s1364_s3 }
 0xacf   :  { %v598_v50 = vpop.permute.xlu1 %597 }
 0xad0   :  { %1175 = vmatmul.mubr.msk.f32.vlgmr.msra.gmra.mxu1 %vm153_vm2, %v598_v50 }
 0xad1   :  { %1189 = vmatpush3.msra.mxu1 %v1416_v1  ;;  %1196 = vmatprep.mubr.msk.f32.mxu1 %vm1361_vm0, %v1360_v0 }
 0xad2   :  { %1190 = vmatprep.subr.mxu1 %v1360_v0 }
 0xad3   :  { %1191 = vmatpush3.msra.mxu1 %v1418_v3 }
 0xad4   :  { %1192 = vmatprep.subr.mxu1 %v1360_v0 }
 0xad5   :  { %1193 = vmatpush3.msra.mxu1 %v1426_v6 }
 0xad6   :  { %1194 = vmatprep.subr.mxu1 %v1360_v0 }
 0xad7   :  { %1195 = vmatpush3.msra.mxu1 %v1433_v8 }
 0xb90   :  { %v667_v51 = vpop.f32.mrf.mxu1 }
 0xb91   :  { %v681_v52 = vadd.f32 %v667_v51, %v1462_v13  ;;  %v672_v55 = vrot.slane %v667_v51, 4 }
 0xb92   :  { %v1176_v53 = vpop.f32.mrf.mxu1 }
 0xb93   :  { %v683_v54 = vrot.slane %v681_v52, 4  ;;  %v674_v56 = vadd.f32 %v672_v55, %v1469_v21 }
 0xb95   :  { %684 = vrot.lane.b32.xlu0 %v683_v54, %s1362_s0  ;;  %v1065_v57 = vmul.f32 -1.442695, %v674_v56 }
 0xb97   :  { %1245 = vpow2.f32 %v1065_v57 }
 0xba4   :  { %v1246_v58 = vpop.eup %1245 }
 0xba5   :  { %v678_v59 = vadd.f32 1.0, %v1246_v58 }
 0xba7   :  { %1247 = vrcp.f32 %v678_v59 }
 0xbb4   :  { %v1248_v60 = vpop.eup %1247 }
 0xbb5   :  { %v694_v7 = vsub.f32 1.0, %v1248_v60  ;;  %v702_v10 = vmul.f32 %v1248_v60, %v700_v5 }
 0xc07   :  { %v685_v61 = vpop.permute.xlu0 %684 }
 0xc08   :  { %v687_v62 = vmul.f32 %v1248_v60, %v685_v61 }
 0xc0a   :  { %689 = vrot.lane.b32.xlu1 %v687_v62, %s1362_s0 }
 0xc7c   :  { %v690_v63 = vpop.permute.xlu1 %689 }
 0xc7d   :  { %v692_v2 = vadd.f32 %v690_v63, %v1469_v21 }
 0xc7f   :  { %1249 = vtanh.f32 %v692_v2 }
 0xc8c   :  { %v1250_v4 = vpop.eup %1249 }
 0xc8d   :  { %696 = vrot.lane.b32.xlu0 %v1250_v4, %s1364_s3 }
 0xcff   :  { %v697_v9 = vpop.permute.xlu0 %696 }
 0xd00   :  { %v699_v11 = vmul.f32 %v697_v9, %v694_v7 }
 0xd02   :  { %v703_v12 = vadd.f32 %v702_v10, %v699_v11 }
 0xd04   :  { %v705_v14 = vrot.slane %v703_v12, 4  ;;  %v809_v27 = vrot.slane %v703_v12, 7 }
 0xd06   :  { %706 = vrot.lane.b32.xlu1 %v705_v14, %s1364_s3 }
 0xd78   :  { %v707_v15 = vpop.permute.xlu1 %706 }
 0xd79   :  { %1186 = vmatmul.mubr.msk.f32.vlgmr.msra.gmra.mxu0 %vm153_vm2, %v707_v15 }
 0xd7a   :  { %1200 = vmatpush3.msra.mxu0 %v1416_v1  ;;  %1207 = vmatprep.mubr.msk.f32.mxu0 %vm1361_vm0, %v1360_v0 }
 0xd7b   :  { %1201 = vmatprep.subr.mxu0 %v1360_v0 }
 0xd7c   :  { %1202 = vmatpush3.msra.mxu0 %v1418_v3 }
 0xd7d   :  { %1203 = vmatprep.subr.mxu0 %v1360_v0 }
 0xd7e   :  { %1204 = vmatpush3.msra.mxu0 %v1426_v6 }
 0xd7f   :  { %1205 = vmatprep.subr.mxu0 %v1360_v0 }
 0xd80   :  { %1206 = vmatpush3.msra.mxu0 %v1433_v8 }
 0xe39   :  { %v776_v16 = vpop.f32.mrf.mxu0 }
 0xe3a   :  { %v790_v17 = vadd.f32 %v776_v16, %v1462_v13  ;;  %v781_v19 = vrot.slane %v776_v16, 3 }
 0xe3b   :  { %v1187_v18 = vpop.f32.mrf.mxu0 }
 0xe3c   :  { %v792_v1 = vrot.slane %v790_v17, 3  ;;  %v783_v20 = vadd.f32 %v781_v19, %v1469_v21 }
 0xe3e   :  { %793 = vrot.lane.b32.xlu0 %v792_v1, %s1362_s0  ;;  %v1067_v22 = vmul.f32 -1.442695, %v783_v20 }
 0xe40   :  { %1251 = vpow2.f32 %v1067_v22 }
 0xe4d   :  { %v1252_v3 = vpop.eup %1251 }
 0xe4e   :  { %v787_v23 = vadd.f32 1.0, %v1252_v3 }
 0xe50   :  { %1253 = vrcp.f32 %v787_v23 }
 0xe5d   :  { %v1254_v6 = vpop.eup %1253 }
 0xe5e   :  { %v803_v28 = vsub.f32 1.0, %v1254_v6  ;;  %v811_v30 = vmul.f32 %v1254_v6, %v809_v27 }
 0xeb0   :  { %v794_v24 = vpop.permute.xlu0 %793 }
 0xeb1   :  { %v796_v0 = vmul.f32 %v1254_v6, %v794_v24 }
 0xeb3   :  { %798 = vrot.lane.b32.xlu1 %v796_v0, %s1362_s0 }
 0xf25   :  { %v799_v8 = vpop.permute.xlu1 %798 }
 0xf26   :  { %v801_v25 = vadd.f32 %v799_v8, %v1469_v21 }
 0xf28   :  { %1255 = vtanh.f32 %v801_v25 }
 0xf35   :  { %v1256_v26 = vpop.eup %1255 }
 0xf36   :  { %805 = vrot.lane.b32.xlu0 %v1256_v26, %s1364_s3 }
 0xfa8   :  { %v806_v29 = vpop.permute.xlu0 %805 }
 0xfa9   :  { %v808_v31 = vmul.f32 %v806_v29, %v803_v28 }
 0xfab   :  { %v812_v32 = vadd.f32 %v811_v30, %v808_v31 }
 0xfad   :  { %v814_v33 = vrot.slane %v812_v32, 5  ;;  %v918_v50 = vrot.slane %v812_v32, 7 }
 0xfaf   :  { %815 = vrot.lane.b32.xlu1 %v814_v33, %s1364_s3 }
0x1021   :  { %v816_v34 = vpop.permute.xlu1 %815 }
0x1022   :  { %1197 = vmatmul.mubr.msk.f32.vlgmr.msra.gmra.mxu1 %vm153_vm2, %v816_v34 }
0x10e2   :  { %v885_v35 = vpop.f32.mrf.mxu1 }
0x10e3   :  { %v899_v36 = vadd.f32 %v885_v35, %v1462_v13  ;;  %v890_v39 = vrot.slane %v885_v35, 2 }
0x10e4   :  { %v1198_v37 = vpop.f32.mrf.mxu1 }
0x10e5   :  { %v901_v38 = vrot.slane %v899_v36, 2  ;;  %v892_v40 = vadd.f32 %v890_v39, %v1469_v21 }
0x10e7   :  { %902 = vrot.lane.b32.xlu0 %v901_v38, %s1362_s0  ;;  %v1069_v41 = vmul.f32 -1.442695, %v892_v40 }
0x10e9   :  { %1257 = vpow2.f32 %v1069_v41 }
0x10f6   :  { %v1258_v42 = vpop.eup %1257 }
0x10f7   :  { %v896_v43 = vadd.f32 1.0, %v1258_v42 }
0x10f9   :  { %1259 = vrcp.f32 %v896_v43 }
0x1106   :  { %v1260_v44 = vpop.eup %1259 }
0x1107   :  { %v912_v51 = vsub.f32 1.0, %v1260_v44  ;;  %v920_v53 = vmul.f32 %v1260_v44, %v918_v50 }
0x1159   :  { %v903_v45 = vpop.permute.xlu0 %902 }
0x115a   :  { %v905_v46 = vmul.f32 %v1260_v44, %v903_v45 }
0x115c   :  { %907 = vrot.lane.b32.xlu1 %v905_v46, %s1362_s0 }
0x11ce   :  { %v908_v47 = vpop.permute.xlu1 %907 }
0x11cf   :  { %v910_v48 = vadd.f32 %v908_v47, %v1469_v21 }
0x11d1   :  { %1261 = vtanh.f32 %v910_v48 }
0x11de   :  { %v1262_v49 = vpop.eup %1261 }
0x11df   :  { %914 = vrot.lane.b32.xlu0 %v1262_v49, %s1364_s3 }
0x1251   :  { %v915_v52 = vpop.permute.xlu0 %914 }
0x1252   :  { %v917_v54 = vmul.f32 %v915_v52, %v912_v51 }
0x1254   :  { %v921_v55 = vadd.f32 %v920_v53, %v917_v54 }
0x1256   :  { %v923_v56 = vrot.slane %v921_v55, 6  ;;  %v1027_v14 = vrot.slane %v921_v55, 7 }
0x1258   :  { %924 = vrot.lane.b32.xlu1 %v923_v56, %s1364_s3 }
0x12ca   :  { %v925_v57 = vpop.permute.xlu1 %924 }
0x12cb   :  { %1208 = vmatmul.mubr.msk.f32.vlgmr.msra.gmra.mxu0 %vm153_vm2, %v925_v57 }
0x138b   :  { %v994_v58 = vpop.f32.mrf.mxu0 }
0x138c   :  { %v1008_v59 = vadd.f32 %v994_v58, %v1462_v13  ;;  %v999_v62 = vrot.slane %v994_v58, 1 }
0x138d   :  { %v1209_v60 = vpop.f32.mrf.mxu0 }
0x138e   :  { %v1010_v61 = vrot.slane %v1008_v59, 1  ;;  %v1001_v63 = vadd.f32 %v999_v62, %v1469_v21 }
0x1390   :  { %1011 = vrot.lane.b32.xlu0 %v1010_v61, %s1362_s0  ;;  %v1071_v2 = vmul.f32 -1.442695, %v1001_v63 }
0x1392   :  { %1263 = vpow2.f32 %v1071_v2 }
0x139f   :  { %v1264_v4 = vpop.eup %1263 }
0x13a0   :  { %v1005_v5 = vadd.f32 1.0, %v1264_v4 }
0x13a2   :  { %1265 = vrcp.f32 %v1005_v5 }
0x13af   :  { %v1266_v7 = vpop.eup %1265 }
0x13b0   :  { %v1021_v15 = vsub.f32 1.0, %v1266_v7  ;;  %v1029_v17 = vmul.f32 %v1266_v7, %v1027_v14 }
0x1402   :  { %v1012_v9 = vpop.permute.xlu0 %1011 }
0x1403   :  { %v1014_v10 = vmul.f32 %v1266_v7, %v1012_v9 }
0x1405   :  { %1016 = vrot.lane.b32.xlu1 %v1014_v10, %s1362_s0 }
0x1477   :  { %v1017_v11 = vpop.permute.xlu1 %1016 }
0x1478   :  { %v1019_v13 = vadd.f32 %v1017_v11, %v1469_v21 }
0x147a   :  { %1267 = vtanh.f32 %v1019_v13 }
0x1487   :  { %v1268_v12 = vpop.eup %1267 }
0x1488   :  { %1023 = vrot.lane.b32.xlu0 %v1268_v12, %s1364_s3 }
0x14fa   :  { %v1024_v16 = vpop.permute.xlu0 %1023 }
0x14fb   :  { %v1026_v18 = vmul.f32 %v1024_v16, %v1021_v15 }
0x14fd   :  { %v1030_v1 = vadd.f32 %v1029_v17, %v1026_v18 }
0x14ff   :  { %1032 = vrot.lane.b32.xlu1 %v1030_v1, %s1364_s3 }
0x1571   :  { %v1033_v19 = vpop.permute.xlu1 %1032 }
0x1572   :  { %1036 = vst.msk [vmem:[#allocation8 - $0x7] sm:$0x80] %vm1035_vm3, %v1033_v19 }
0x1573   :  { %1340 = shalt.err (!%p1337_p5)
}
0x1574   :  { %1046 = dma.vmem_to_hbm [thread:$0]  %s1044_s19, 16, %s1589_s6, [#allocation4]  }
0x1575   :  { %1353 = dma.done.wait [#allocation4], 16  }
0x1576   :  { %1354 = vsyncadd [#allocation4], 4294967280 }
0x1577   :  { %1050 = vsyncpa [#allocation3], 1 }
0x1578   :  { %1051 = vsyncpa [#allocation6], 1 }
0x1579   :  { %1052 = vsyncpa [#allocation4], 1 }

</bundles_post_ra>
